<compile_context>
chip_gen: v7x
topology: tpu7x:2x2x1
jax: 0.10.0
libtpu: 0.0.40
codegen_flags: <defaults>
</compile_context>

<pallas_src>
import jax
import jax.numpy as jnp
from jax.experimental import pallas as pl
from jax.experimental.pallas import tpu as pltpu


def _round_up(a, b):
    return (a + b - 1) // b * b


def _vmem_capacity_bytes():
    """Physical VMEM per TensorCore (generation-aware); conservative fallback."""
    try:
        return int(pltpu.get_tpu_info().vmem_capacity_bytes)
    except Exception:
        return 64 * 1024 * 1024          # v7x per-TC size: safe lower bound


def _choose_tiles(n, hp, op, vmem_cap):
    """Pick (tm, tk) for the phase-2 grid.

    K-tiling makes the working set O(tm*tk), independent of N, so every
    generation can keep DMA strips near/above the ~512-row knee of the HBM
    efficiency curve.  Budget ~35% of physical VMEM, leaving headroom for
    Mosaic internal scratch and in-kernel temps the estimate only approximates.
    """
    budget = max(int(vmem_cap * 0.35), 8 * 1024 * 1024)
    np128 = _round_up(n, 128)
    for tm in (512, 256, 128):
        if tm > np128:
            continue
        for tk in (2048, 1024, 512, 256, 128):
            if tk > np128:
                continue
            # Avoid blowing up row/col padding for mid-size N.
            waste = _round_up(np128, max(tm, tk)) - np128
            if waste > np128 // 4:
                continue
            use = (2 * 2 * tm * tk * 2              # A_ud/A_lr tiles, 2x buffered, bf16
                   + 2 * tk * hp * 2                # x K-strip, 2x buffered, bf16
                   + 2 * tm * hp * 2                # x row tile, 2x buffered, bf16
                   + 2 * (3 * hp * op * 2 + op * 4)  # weight slabs + bias
                   + 2 * tm * op * 4                # output tile, 2x buffered
                   + 2 * tm * hp * 4                # h_ud/h_lr f32 scratch
                   + tm * op * 4 + 2 * tm * hp * 2)  # in-kernel temps (estimate)
            if use <= budget:
                return tm, tk
    return 128, 128


# ---------------------------------------------------------------------------
# Phase 1: global node accumulation.  hg_sum = sum_i mask[i] * relu(x_i @ Wg + bg)
# (1/n scale and linear_go are finalized in the wrapper as plain XLA.)
# ---------------------------------------------------------------------------
def gnn_global_kernel(x_ref, mask_ref, wg_ref, bg_ref, hg_ref):
    i = pl.program_id(0)

    @pl.when(i == 0)
    def _init():
        hg_ref[...] = jnp.zeros_like(hg_ref)

    g = jnp.maximum(
        jnp.dot(x_ref[...], wg_ref[...], preferred_element_type=jnp.float32)
        + bg_ref[...], 0.0)
    # VPU multiply + sublane reduce (co-issues with the MXU matmul) instead of
    # an M=1 MXU matmul against the mask row.
    hg_ref[...] += jnp.sum(g * mask_ref[...], axis=0, keepdims=True)


# ---------------------------------------------------------------------------
# Phase 2: K-tiled message passing + fused output linears + global term + ReLU
#   grid = (row tiles i [parallel], adjacency-column tiles k [arbitrary])
# ---------------------------------------------------------------------------
def gnn_main_kernel(a_ud_ref, a_lr_ref, xk_ref, xrow_ref,
                    wl_ref, wud_ref, wlr_ref, bias_ref,
                    h_ref, hud_acc, hlr_acc):
    k = pl.program_id(1)

    @pl.when(k == 0)
    def _init():
        hud_acc[...] = jnp.zeros_like(hud_acc)
        hlr_acc[...] = jnp.zeros_like(hlr_acc)

    xk = xk_ref[...]                                            # (tk, Hp) bf16
    hud_acc[...] += jnp.dot(a_ud_ref[...], xk,
                            preferred_element_type=jnp.float32)
    hlr_acc[...] += jnp.dot(a_lr_ref[...], xk,
                            preferred_element_type=jnp.float32)

    @pl.when(k == pl.num_programs(1) - 1)
    def _finalize():
        # Three Hp-K matmuls summed in f32 (no (tm, 3*Hp) concat copy).
        h = jnp.dot(xrow_ref[...], wl_ref[...],
                    preferred_element_type=jnp.float32)
        h += jnp.dot(hud_acc[...].astype(jnp.bfloat16), wud_ref[...],
                     preferred_element_type=jnp.float32)
        h += jnp.dot(hlr_acc[...].astype(jnp.bfloat16), wlr_ref[...],
                     preferred_element_type=jnp.float32)
        h_ref[...] = jnp.maximum(h + bias_ref[...], 0.0).astype(h_ref.dtype)


# ---------------------------------------------------------------------------
# Wrapper
# ---------------------------------------------------------------------------
def gnn_layer_forward(x, mask, a_ud, a_lr, params, *, tm=None, tk=None,
                      out_dtype=jnp.float32):
    """x: (num_sent, sent_len, hidden); mask: (N,); a_ud/a_lr: (N, N) dense.
    Returns (h: (num_sent, sent_len, out_dim), h_g: (1, out_dim))."""
    f32, bf16 = jnp.float32, jnp.bfloat16
    num_sent, sent_len, hidden = x.shape
    N = num_sent * sent_len
    out_dim = params["wl"].shape[1]

    Hp = _round_up(hidden, 128)      # lane-dense feature dims
    Op = _round_up(out_dim, 128)

    vmem_cap = _vmem_capacity_bytes()
    vmem_limit = min(int(vmem_cap * 0.6), 100 * 1024 * 1024)

    if tm is None or tk is None:
        auto_tm, auto_tk = _choose_tiles(N, Hp, Op, vmem_cap)
        tm = tm or auto_tm
        tk = tk or auto_tk

    Np = _round_up(_round_up(N, 128), max(tm, tk))
    nt, kt = Np // tm, Np // tk

    # ---- pad + cast operands (bf16 first: no full-size f32 intermediates) ----
    def pad2d(arr, rows, cols):
        r, c = arr.shape
        if (r, c) == (rows, cols):
            return arr
        return jnp.pad(arr, ((0, rows - r), (0, cols - c)))

    a_ud_p = pad2d(a_ud.astype(bf16), Np, Np)
    a_lr_p = pad2d(a_lr.astype(bf16), Np, Np)
    x2d = pad2d(x.reshape(N, hidden).astype(bf16), Np, Hp)
    mask_col = pad2d(mask.astype(f32).reshape(N, 1), Np, 1)

    wl = pad2d(params["wl"].astype(bf16), Hp, Op)
    wud = pad2d(params["wud"].astype(bf16), Hp, Op)
    wlr = pad2d(params["wlr"].astype(bf16), Hp, Op)
    wg = pad2d(params["wg"].astype(bf16), Hp, Op)

    def pad_b(b):
        return pad2d(b.reshape(1, -1).astype(f32), 1, Op)

    bg = pad_b(params["bg"])
    b_sum = pad_b(params["bl"]) + pad_b(params["bud"]) + pad_b(params["blr"])

    # ---- phase 1: global-node reduction across row tiles ---------------------
    hg_sum = pl.pallas_call(
        gnn_global_kernel,
        grid=(nt,),
        in_specs=[
            pl.BlockSpec((tm, Hp), lambda i: (i, 0)),      # x row tile
            pl.BlockSpec((tm, 1), lambda i: (i, 0)),       # mask column tile
            pl.BlockSpec((Hp, Op), lambda i: (0, 0)),      # Wg (resident)
            pl.BlockSpec((1, Op), lambda i: (0, 0)),       # bg (resident)
        ],
        out_specs=pl.BlockSpec((1, Op), lambda i: (0, 0)),
        out_shape=jax.ShapeDtypeStruct((1, Op), f32),
        compiler_params=pltpu.CompilerParams(
            dimension_semantics=("arbitrary",),            # cross-tile accumulator
            vmem_limit_bytes=vmem_limit),
    )(x2d, mask_col, wg, bg)

    # Finalize in plain XLA (negligible work): 1/n scale + linear_go.
    # Matches PyTorch exactly (mask.sum()==0 -> inf/nan, no epsilon guard).
    n = jnp.sum(mask.astype(f32))
    h_g = hg_sum[:, :out_dim] / n                                  # (1, out_dim)
    go = (h_g @ params["wgo"].astype(f32)
          + params["bgo"].reshape(1, -1).astype(f32))              # (1, out_dim)
    bias_all = b_sum + pad2d(go, 1, Op)                            # (1, Op)

    # ---- phase 2: K-tiled message passing + fused linears + ReLU -------------
    flops = 2 * (2 * Np * Np * Hp) + 3 * (2 * Np * Hp * Op)
    bytes_accessed = (2 * Np * Np * 2 + (nt + 1) * Np * Hp * 2
                      + 3 * Hp * Op * 2 + Np * Op * jnp.dtype(out_dtype).itemsize)

    h_p = pl.pallas_call(
        gnn_main_kernel,
        grid=(nt, kt),
        in_specs=[
            pl.BlockSpec((tm, tk), lambda i, k: (i, k)),   # A_ud tile
            pl.BlockSpec((tm, tk), lambda i, k: (i, k)),   # A_lr tile
            pl.BlockSpec((tk, Hp), lambda i, k: (k, 0)),   # x K-strip (matmul RHS)
            pl.BlockSpec((tm, Hp), lambda i, k: (i, 0)),   # x row tile (self term)
            pl.BlockSpec((Hp, Op), lambda i, k: (0, 0)),   # Wl (resident)
            pl.BlockSpec((Hp, Op), lambda i, k: (0, 0)),   # Wud (resident)
            pl.BlockSpec((Hp, Op), lambda i, k: (0, 0)),   # Wlr (resident)
            pl.BlockSpec((1, Op), lambda i, k: (0, 0)),    # bl+bud+blr+go
        ],
        out_specs=pl.BlockSpec((tm, Op), lambda i, k: (i, 0)),
        out_shape=jax.ShapeDtypeStruct((Np, Op), out_dtype),
        scratch_shapes=[pltpu.VMEM((tm, Hp), jnp.float32),     # h_ud accumulator
                        pltpu.VMEM((tm, Hp), jnp.float32)],    # h_lr accumulator
        compiler_params=pltpu.CompilerParams(
            dimension_semantics=("parallel", "arbitrary"),     # rows shard on megacore
            vmem_limit_bytes=vmem_limit),
        cost_estimate=pl.CostEstimate(
            flops=flops, transcendentals=0, bytes_accessed=bytes_accessed),
    )(a_ud_p, a_lr_p, x2d, x2d, wl, wud, wlr, bias_all)

    h = h_p[:N, :out_dim].reshape(num_sent, sent_len, out_dim)
    return h, h_g


# ---------------------------------------------------------------------------
# Params + pure-JAX reference
# ---------------------------------------------------------------------------
def make_params(key, input_dim, output_dim):
    """Deterministic nn.Linear-style init; weights stored as (in, out)."""
    ks = jax.random.split(key, 10)

    def linear(kw, kb, fan_in, fan_out):
        bound = 1.0 / jnp.sqrt(fan_in)
        w = jax.random.uniform(kw, (fan_in, fan_out), jnp.float32, -bound, bound)
        b = jax.random.uniform(kb, (1, fan_out), jnp.float32, -bound, bound)
        return w, b

    wl, bl = linear(ks[0], ks[1], input_dim, output_dim)
    wud, bud = linear(ks[2], ks[3], input_dim, output_dim)
    wlr, blr = linear(ks[4], ks[5], input_dim, output_dim)
    wg, bg = linear(ks[6], ks[7], input_dim, output_dim)
    wgo, bgo = linear(ks[8], ks[9], output_dim, output_dim)
    return dict(wl=wl, bl=bl, wud=wud, bud=bud, wlr=wlr, blr=blr,
                wg=wg, bg=bg, wgo=wgo, bgo=bgo)


def gnn_layer_reference(x, mask, a_ud, a_lr, p):
    """Pure-JAX reference mirroring the kernel's bf16 input casts
    (all accumulation in f32, same structure as the PyTorch forward)."""
    bf = lambda t: t.astype(jnp.bfloat16).astype(jnp.float32)
    num_sent, sent_len, hidden = x.shape
    xf = bf(x.reshape(-1, hidden))
    h_ud = bf(bf(a_ud) @ xf)
    h_lr = bf(bf(a_lr) @ xf)
    h = (xf @ bf(p["wl"]) + h_ud @ bf(p["wud"]) + h_lr @ bf(p["wlr"])
         + p["bl"] + p["bud"] + p["blr"])
    g = jnp.maximum(xf @ bf(p["wg"]) + p["bg"], 0.0)
    n = jnp.sum(mask.astype(jnp.float32))
    h_g = (mask.astype(jnp.float32).reshape(1, -1) @ g) / n
    go = h_g @ p["wgo"] + p["bgo"]
    h = jnp.maximum(h + go, 0.0)
    return h.reshape(num_sent, sent_len, -1), h_g


if __name__ == "__main__":
    key = jax.random.PRNGKey(0)
    # Small but non-trivial: N = 2 * 96 = 192 nodes (padded to 256).  Explicit
    # tm=tk=128 makes the demo run a 2x2 phase-2 grid, exercising the padding,
    # the K-tiled f32 VMEM accumulators and the cross-tile global-node reduction.
    num_sent, sent_len, hidden, out_dim = 2, 96, 32, 32
    N = num_sent * sent_len

    k_x, k_a1, k_a2, k_m, k_p = jax.random.split(key, 5)
    x = jax.random.normal(k_x, (num_sent, sent_len, hidden), jnp.float32)
    a_ud = jax.random.uniform(k_a1, (N, N), jnp.float32)
    a_lr = jax.random.uniform(k_a2, (N, N), jnp.float32)
    mask = (jax.random.uniform(k_m, (N,)) > 0.3).astype(jnp.float32)
    params = make_params(k_p, hidden, out_dim)

    h, h_g = gnn_layer_forward(x, mask, a_ud, a_lr, params, tm=128, tk=128)
    jax.block_until_ready((h, h_g))

    h_ref, h_g_ref = gnn_layer_reference(x, mask, a_ud, a_lr, params)
    assert h.shape == (num_sent, sent_len, out_dim) and h_g.shape == (1, out_dim)
    assert jnp.allclose(h, h_ref, atol=2e-2, rtol=2e-2), \
        float(jnp.max(jnp.abs(h - h_ref)))
    assert jnp.allclose(h_g, h_g_ref, atol=2e-2, rtol=2e-2), \
        float(jnp.max(jnp.abs(h_g - h_g_ref)))

    print("KERNEL_OK")
</pallas_src>

<mosaic_0001>
module attributes {stable_mosaic.version = 11 : i64} {
  func.func @gnn_global_kernel(%arg0: i32, %arg1: memref<128x128xbf16, #tpu.memory_space<vmem>>, %arg2: memref<128x1xf32, #tpu.memory_space<vmem>>, %arg3: memref<128x128xbf16, #tpu.memory_space<vmem>>, %arg4: memref<1x128xf32, #tpu.memory_space<vmem>>, %arg5: memref<1x128xf32, #tpu.memory_space<vmem>>) attributes {dimension_semantics = [#tpu.dimension_semantics<arbitrary>], iteration_bounds = array<i64: 2>, scalar_prefetch = 0 : i64, scratch_operands = 0 : i64, tpu.core_type = #tpu.core_type<tc>, window_params = [{transform_indices = @transform_0, window_bounds = array<i64: 128, 128>}, {transform_indices = @transform_1, window_bounds = array<i64: 128, 1>}, {pipeline_mode = #tpu.pipeline_mode<synchronous>, transform_indices = @transform_2, window_bounds = array<i64: 128, 128>}, {pipeline_mode = #tpu.pipeline_mode<synchronous>, transform_indices = @transform_3, window_bounds = array<i64: 1, 128>}, {pipeline_mode = #tpu.pipeline_mode<synchronous>, transform_indices = @transform_4, window_bounds = array<i64: 1, 128>}]} {
    %c0_i32 = arith.constant 0 : i32
    %0 = arith.cmpi eq, %arg0, %c0_i32 : i32
    %1 = arith.extui %0 : i1 to i32
    %c0_i32_0 = arith.constant 0 : i32
    %2 = arith.cmpi ne, %1, %c0_i32_0 : i32
    scf.if %2 {
      %cst_14 = arith.constant 0.000000e+00 : f32
      %19 = vector.broadcast %cst_14 : f32 to vector<1x128xf32>
      %c0_15 = arith.constant 0 : index
      %c0_16 = arith.constant 0 : index
      %20 = vector.load %arg5[%c0_15, %c0_16] : memref<1x128xf32, #tpu.memory_space<vmem>>, vector<1x128xf32>
      tpu.vector_store %arg5[%c0_15, %c0_16], %19 {strides = array<i32>} : memref<1x128xf32, #tpu.memory_space<vmem>>, vector<1x128xf32>,
    } else {
    }
    %c0 = arith.constant 0 : index
    %c0_1 = arith.constant 0 : index
    %3 = vector.load %arg1[%c0, %c0_1] : memref<128x128xbf16, #tpu.memory_space<vmem>>, vector<128x128xbf16>
    %c0_2 = arith.constant 0 : index
    %c0_3 = arith.constant 0 : index
    %4 = vector.load %arg3[%c0_2, %c0_3] : memref<128x128xbf16, #tpu.memory_space<vmem>>, vector<128x128xbf16>
    %cst = arith.constant dense<0.000000e+00> : vector<128x128xf32>
    %5 = tpu.matmul %3, %4, %cst {dimension_numbers = #tpu.dot_dimension_numbers<[1], [0], [0], [1], [0, 0, 1, 1], [], []>} : vector<128x128xbf16>, vector<128x128xbf16>, vector<128x128xf32> -> vector<128x128xf32>
    %c0_4 = arith.constant 0 : index
    %c0_5 = arith.constant 0 : index
    %6 = vector.load %arg4[%c0_4, %c0_5] : memref<1x128xf32, #tpu.memory_space<vmem>>, vector<1x128xf32>
    %7 = vector.broadcast %6 : vector<1x128xf32> to vector<128x128xf32>
    %8 = arith.addf %5, %7 : vector<128x128xf32>
    %cst_6 = arith.constant 0.000000e+00 : f32
    %9 = vector.broadcast %cst_6 : f32 to vector<128x128xf32>
    %10 = arith.maximumf %8, %9 : vector<128x128xf32>
    %c0_7 = arith.constant 0 : index
    %c0_8 = arith.constant 0 : index
    %11 = vector.load %arg5[%c0_7, %c0_8] : memref<1x128xf32, #tpu.memory_space<vmem>>, vector<1x128xf32>
    %c0_9 = arith.constant 0 : index
    %c0_10 = arith.constant 0 : index
    %12 = vector.load %arg2[%c0_9, %c0_10] : memref<128x1xf32, #tpu.memory_space<vmem>>, vector<128x1xf32>
    %13 = vector.broadcast %12 : vector<128x1xf32> to vector<128x128xf32>
    %14 = arith.mulf %10, %13 : vector<128x128xf32>
    %cst_11 = arith.constant dense<0.000000e+00> : vector<128xf32>
    %15 = vector.multi_reduction <add>, %14, %cst_11 [0] : vector<128x128xf32> to vector<128xf32>
    %16 = vector.shape_cast %15 : vector<128xf32> to vector<1x128xf32>
    %17 = arith.addf %11, %16 : vector<1x128xf32>
    %c0_12 = arith.constant 0 : index
    %c0_13 = arith.constant 0 : index
    %18 = vector.load %arg5[%c0_12, %c0_13] : memref<1x128xf32, #tpu.memory_space<vmem>>, vector<1x128xf32>
    tpu.vector_store %arg5[%c0_12, %c0_13], %17 {strides = array<i32>} : memref<1x128xf32, #tpu.memory_space<vmem>>, vector<1x128xf32>,
    return
  }
  func.func @transform_0(%arg0: i32) -> (i32, i32) {
    %c0_i32 = arith.constant 0 : i32
    %c0_i32_0 = arith.constant 0 : i32
    return %arg0, %c0_i32 : i32, i32
  }
  func.func @transform_1(%arg0: i32) -> (i32, i32) {
    %c0_i32 = arith.constant 0 : i32
    %c0_i32_0 = arith.constant 0 : i32
    return %arg0, %c0_i32 : i32, i32
  }
  func.func @transform_2(%arg0: i32) -> (i32, i32) {
    %c0_i32 = arith.constant 0 : i32
    %c0_i32_0 = arith.constant 0 : i32
    %c0_i32_1 = arith.constant 0 : i32
    return %c0_i32, %c0_i32_0 : i32, i32
  }
  func.func @transform_3(%arg0: i32) -> (i32, i32) {
    %c0_i32 = arith.constant 0 : i32
    %c0_i32_0 = arith.constant 0 : i32
    %c0_i32_1 = arith.constant 0 : i32
    return %c0_i32, %c0_i32_0 : i32, i32
  }
  func.func @transform_4(%arg0: i32) -> (i32, i32) {
    %c0_i32 = arith.constant 0 : i32
    %c0_i32_0 = arith.constant 0 : i32
    %c0_i32_1 = arith.constant 0 : i32
    return %c0_i32, %c0_i32_0 : i32, i32
  }
}

</mosaic_0001>

<bundles_post_ra>
// kernel: tpu_custom_call.1
= control target key start
LH: loop header
LB: loop body
LE: loop exit
PB: predicated region body
PF: predicated region fallthrough
CT: control target
= control target key end

     0   :  { %9 = vsyncpa [#allocation3], 0  ;;  %s851_s15 = smov 0   ;;  %s968_s0 = inlined_call_operand.vmem [shape: bf16[256,128], index: 0, kind: input, shape index: {}]   ;;  %s969_s1 = inlined_call_operand.vmem [shape: f32[256,1], index: 1, kind: input, shape index: {}]   ;;  %s970_s2 = inlined_call_operand.vmem [shape: bf16[128,128], index: 2, kind: input, shape index: {}]   ;;  %s971_s3 = inlined_call_operand.vmem [shape: f32[1,128], index: 3, kind: input, shape index: {}]   ;;  %s972_s4 = inlined_call_operand.hbm [shape: f32[1,128], index: 4, kind: output, shape index: {}]  }
   0x1 LB: > { %s857_s16 = sadd.s32 4294967295, %s821_s15   ;;  %p659_p0 = scmp.ge.s32.totalorder %s821_s15, 1  ;;  %s821_s15 = sphi %s851_s15, %s15_s15  }
   0x2   : > { %p170_p1 = scmp.lt.s32.totalorder %s821_s15, 3 }
   0x4   : > { %p171_p2 = pnand %p659_p0, %p170_p1 }
   0x5   : > { %s660_s17 = sshll.u32 (!%p171_p2), %s857_s16, 4  ;;  %p664_p4 = scmp.ne.s32.totalorder (!%p171_p2), %s857_s16, 0 }
   0x6   : > { %174 = sbr.rel (%p171_p2) target bundleno = 334 (0x14e), region = 36  ;;  %p197_p3 = scmp.lt.s32.totalorder (!%p171_p2), %s660_s17, 31 }
   0xd   : > { %s974_s17 = smov (!%p197_p3, %s660_s17), 31  ;;  %212 = sbr.rel (%p664_p4) target bundleno = 20 (0x14), region = 40 }
   0xe   : > { %s661_s18 = sshll.u32 %s974_s17, 2  ;;  %s663_s19 = sshll.u32 %s974_s17, 3  ;;  %v823_v0 = vmov (!%p664_p4), 0.0  }
   0xf   : > { %s865_s22 = scalar_lea.vmem %s968_s0, %s661_s18  ;;  %s870_s25 = scalar_lea.vmem %s969_s1, %s663_s19  ;;  %213 = vst [vmem:[#allocation2] sm:$0x1] (!%p664_p4), %v823_v0 }
  0x14 PF: > { %v769_v1 = vld [vmem:[%s970_s2] sm:$0xff]   ;;  %v770_v2 = vld [vmem:[%s970_s2 + $0x8] sm:$0xff]   ;;  %v824_v3 = vmov 0   ;;  %v771_v4 = vld [vmem:[%s970_s2 + $0x10] sm:$0xff]   ;;  %s825_s20 = smov [#allocation2]   ;;  %p754_p5 = scmp.eq.s32.totalorder %s857_s16, 1 }
  0x15   : > { %767 = vset.pattern.permute.xlu0 %v824_v3  ;;  %768 = vset.pattern.permute.xlu1 %v824_v3  ;;  %v772_v5 = vld [vmem:[%s970_s2 + $0x18] sm:$0xff]   ;;  %v777_v6 = vld [vmem:[%s865_s22] sm:$0xff]   ;;  %v774_v9 = vld [vmem:[%s970_s2 + $0x28] sm:$0xff]   ;;  %s605_s21 = sshll.u32 %s825_s20, 4  ;;  %s606_s21 = int_to_ptr.vmem [resolvable:$true] %s605_s21 }
  0x16   : > { %702 = vmatprep.subr.bf16.mxu0 %v769_v1  ;;  %734 = vmatprep.subr.bf16.mxu1 %v769_v1  ;;  %v778_v7 = vld [vmem:[%s865_s22 + $0x20] sm:$0xff]   ;;  %v465_v11 = vld [vmem:[%s870_s25 + $0x10] sm:$0xff]  ;;  %v464_v12 = vld [vmem:[%s870_s25 + $0x8] sm:$0xff]  ;;  %s791_s23 = scalar_lea.vmem %s606_s21, 32  ;;  %p792_p9 = scmp.lt.s32.totalorder %s606_s21, %s606_s21 }
  0x17   : > { %703 = vmatpush3.bf16.msra.mxu0 %v769_v1  ;;  %742 = vmatpush3.bf16.msra.mxu1 %v769_v1  ;;  %v773_v8 = vld [vmem:[%s970_s2 + $0x20] sm:$0xff]   ;;  %v466_v13 = vld [vmem:[%s870_s25 + $0x18] sm:$0xff]  ;;  %v775_v14 = vld [vmem:[%s970_s2 + $0x30] sm:$0xff]  }
  0x18   : > { %704 = vmatprep.subr.bf16.mxu0 %v770_v2  ;;  %735 = vmatprep.subr.bf16.mxu1 %v770_v2  ;;  %v463_v10 = vld [vmem:[%s870_s25] sm:$0xff]  ;;  %v468_v16 = vld [vmem:[%s870_s25 + $0x28] sm:$0xff]  ;;  %v776_v17 = vld [vmem:[%s970_s2 + $0x38] sm:$0xff]  }
  0x19   : > { %718 = vmatprep.mubr.bf16.mxu0 %v777_v6  ;;  %726 = vmatprep.mubr.bf16.mxu1 %v778_v7  ;;  %v467_v15 = vld [vmem:[%s870_s25 + $0x20] sm:$0xff]  ;;  %v469_v18 = vld [vmem:[%s870_s25 + $0x30] sm:$0xff]  ;;  %v470_v19 = vld [vmem:[%s870_s25 + $0x38] sm:$0xff] }
  0x1a   : > { %481 = vperm.xlu0 %767, %v463_v10   ;;  %491 = vperm.xlu1 %768, %v465_v11   ;;  %v779_v20 = vld [vmem:[%s865_s22 + $0x8] sm:$0xff]   ;;  %v471_v22 = vld [vmem:[%s870_s25 + $0x40] sm:$0xff]  ;;  %v781_v24 = vld [vmem:[%s865_s22 + $0x10] sm:$0xff]  }
  0x1b   : > { %705 = vmatpush3.bf16.msra.mxu0 %v770_v2  ;;  %743 = vmatpush3.bf16.msra.mxu1 %v770_v2  ;;  %v780_v21 = vld [vmem:[%s865_s22 + $0x28] sm:$0xff]   ;;  %v782_v25 = vld [vmem:[%s865_s22 + $0x30] sm:$0xff]   ;;  %v474_v27 = vld [vmem:[%s870_s25 + $0x58] sm:$0xff] }
  0x1c   : > { %706 = vmatprep.subr.bf16.mxu0 %v771_v4  ;;  %736 = vmatprep.subr.bf16.mxu1 %v771_v4  ;;  %v472_v23 = vld [vmem:[%s870_s25 + $0x48] sm:$0xff]  ;;  %v473_v26 = vld [vmem:[%s870_s25 + $0x50] sm:$0xff]  ;;  %v783_v28 = vld [vmem:[%s865_s22 + $0x18] sm:$0xff]  }
  0x1d   : > { %v784_v29 = vld [vmem:[%s865_s22 + $0x38] sm:$0xff]   ;;  %v475_v30 = vld [vmem:[%s870_s25 + $0x60] sm:$0xff]  ;;  %v476_v31 = vld [vmem:[%s870_s25 + $0x68] sm:$0xff]  ;;  %s785_s22 = scalar_lea.vmem %s606_s21, 16 }
  0x1e   : > { %486 = vperm.xlu0 %767, %v464_v12   ;;  %496 = vperm.xlu1 %768, %v466_v13   ;;  %v477_v32 = vld [vmem:[%s870_s25 + $0x70] sm:$0xff]  ;;  %v478_v33 = vld [vmem:[%s870_s25 + $0x78] sm:$0xff]  ;;  %v924_v40 = vld [vmem:[%s971_s3] ss:$0 sm:$0xff]  ;;  %p786_p6 = scmp.ne.s32.totalorder %s606_s21, %s785_s22  ;;  %p793_p10 = scmp.lt.s32.totalorder %s791_s23, %s785_s22 }
  0x1f   : > { %707 = vmatpush3.bf16.msra.mxu0 %v771_v4  ;;  %744 = vmatpush3.bf16.msra.mxu1 %v771_v4 }
  0x20   : > { %708 = vmatprep.subr.bf16.mxu0 %v772_v5  ;;  %737 = vmatprep.subr.bf16.mxu1 %v772_v5  ;;  %p787_p7 = pnand %p786_p6, %p754_p5  ;;  %p794_p11 = por %p793_p10, %p792_p9 }
  0x22   : > { %501 = vperm.xlu0 %767, %v467_v15   ;;  %506 = vperm.xlu1 %768, %v468_v16   ;;  %p788_p8 = pneg %p787_p7 }
  0x23   : > { %709 = vmatpush3.bf16.msra.mxu0 %v772_v5  ;;  %745 = vmatpush3.bf16.msra.mxu1 %v772_v5 }
  0x24   : > { %710 = vmatprep.subr.bf16.mxu0 %v773_v8  ;;  %738 = vmatprep.subr.bf16.mxu1 %v773_v8  ;;  %p795_p12 = pnand %p794_p11, %p788_p8 }
  0x26   : > { %511 = vperm.xlu0 %767, %v469_v18   ;;  %516 = vperm.xlu1 %768, %v470_v19  }
  0x27   : > { %711 = vmatpush3.bf16.msra.mxu0 %v773_v8  ;;  %746 = vmatpush3.bf16.msra.mxu1 %v773_v8 }
  0x28   : > { %712 = vmatprep.subr.bf16.mxu0 %v774_v9  ;;  %739 = vmatprep.subr.bf16.mxu1 %v774_v9 }
  0x2a   : > { %521 = vperm.xlu0 %767, %v471_v22   ;;  %526 = vperm.xlu1 %768, %v472_v23  }
  0x2b   : > { %713 = vmatpush3.bf16.msra.mxu0 %v774_v9  ;;  %747 = vmatpush3.bf16.msra.mxu1 %v774_v9 }
  0x2c   : > { %714 = vmatprep.subr.bf16.mxu0 %v775_v14  ;;  %740 = vmatprep.subr.bf16.mxu1 %v775_v14 }
  0x2e   : > { %531 = vperm.xlu0 %767, %v473_v26   ;;  %536 = vperm.xlu1 %768, %v474_v27  }
  0x2f   : > { %715 = vmatpush3.bf16.msra.mxu0 %v775_v14  ;;  %748 = vmatpush3.bf16.msra.mxu1 %v775_v14 }
  0x30   : > { %716 = vmatprep.subr.bf16.mxu0 %v776_v17  ;;  %741 = vmatprep.subr.bf16.mxu1 %v776_v17 }
  0x32   : > { %541 = vperm.xlu0 %767, %v475_v30   ;;  %546 = vperm.xlu1 %768, %v476_v31  }
  0x33   : > { %717 = vmatpush3.bf16.msra.mxu0 %v776_v17  ;;  %749 = vmatpush3.bf16.msra.mxu1 %v776_v17 }
  0x36   : > { %719 = vmatmul.mubr.bf16.vlgmr.msra.gmra.mrb[0].mxu0 %v779_v20  ;;  %727 = vmatmul.mubr.bf16.vlgmr.msra.gmra.mrb[0].mxu1 %v780_v21 }
  0x37   : > { %722 = vmatprep.mubr.bf16.mxu0 %v781_v24  ;;  %730 = vmatprep.mubr.bf16.mxu1 %v782_v25 }
  0x38   : > { %551 = vperm.xlu0 %767, %v477_v32   ;;  %556 = vperm.xlu1 %768, %v478_v33  }
  0x3e   : > { %723 = vmatmul.mubr.bf16.gmra.mrb[4].mxu0 %v783_v28  ;;  %731 = vmatmul.mubr.bf16.gmra.mrb[4].mxu1 %v784_v29 }
  0x99   : > { %v482_v34 = vpop.permute.xlu0 %481  ;;  %v492_v35 = vpop.permute.xlu1 %491 }
  0x9d   : > { %v487_v36 = vpop.permute.xlu0 %486  ;;  %v497_v37 = vpop.permute.xlu1 %496 }
  0xa1   : > { %v502_v38 = vpop.permute.xlu0 %501  ;;  %v507_v39 = vpop.permute.xlu1 %506 }
  0xa5   : > { %v512_v56 = vpop.permute.xlu0 %511  ;;  %v517_v57 = vpop.permute.xlu1 %516 }
  0xa9   : > { %v522_v19 = vpop.permute.xlu0 %521  ;;  %v527_v24 = vpop.permute.xlu1 %526 }
  0xad   : > { %v532_v33 = vpop.permute.xlu0 %531 }
 0x109   : > { %v720_v41 = vpop.f32.mrb[0].mxu0  ;;  %v728_v42 = vpop.f32.mrb[0].mxu1 }
 0x10a   : > { %v383_v43 = vpop.f32.mrb[1].mxu0  ;;  %v415_v44 = vpop.f32.mrb[1].mxu1  ;;  %v392_v45 = vadd.f32 %v720_v41, %v924_v40  ;;  %v424_v25 = vadd.f32 %v728_v42, %v924_v40 }
 0x10b   : > { %v384_v46 = vadd.f32 %v924_v40, %v383_v43  ;;  %v721_v47 = vpop.f32.mrb[2].mxu0  ;;  %v729_v48 = vpop.f32.mrb[2].mxu1  ;;  %v416_v14 = vadd.f32 %v924_v40, %v415_v44 }
 0x10c   : > { %v395_v49 = vadd.f32 %v721_v47, %v924_v40  ;;  %v386_v50 = vpop.f32.mrb[3].mxu0  ;;  %v418_v51 = vpop.f32.mrb[3].mxu1  ;;  %v448_v54 = vmax.f32 %v392_v45, 0.0  ;;  %v427_v29 = vadd.f32 %v729_v48, %v924_v40 }
 0x10d   : > { %v446_v52 = vmax.f32 %v384_v46, 0.0  ;;  %v387_v53 = vadd.f32 %v924_v40, %v386_v50  ;;  %v419_v20 = vadd.f32 %v924_v40, %v418_v51  ;;  %v454_v26 = vmax.f32 %v416_v14, 0.0  ;;  %v542_v48 = vpop.permute.xlu0 %541 }
 0x10e   : > { %v449_v58 = vmax.f32 %v395_v49, 0.0  ;;  %v561_v1 = vmul.f32 %v492_v35, %v448_v54  ;;  %v457_v41 = vmax.f32 %v427_v29, 0.0 }
 0x10f   : > { %v447_v55 = vmax.f32 %v387_v53, 0.0  ;;  %v559_v59 = vmul.f32 %v482_v34, %v446_v52  ;;  %v455_v30 = vmax.f32 %v419_v20, 0.0  ;;  %v456_v34 = vmax.f32 %v424_v25, 0.0 }
 0x110   : > { %v562_v7 = vmul.f32 %v497_v37, %v449_v58  ;;  %v567_v35 = vmul.f32 %v522_v19, %v454_v26 }
 0x111   : > { %v560_v60 = vmul.f32 %v487_v36, %v447_v55  ;;  %v724_v61 = vpop.f32.mrb[4].mxu0  ;;  %v732_v62 = vpop.f32.mrb[4].mxu1  ;;  %v569_v44 = vmul.f32 %v532_v33, %v456_v34 }
 0x112   : > { %v399_v63 = vpop.f32.mrb[5].mxu0  ;;  %v431_v0 = vpop.f32.mrb[5].mxu1  ;;  %v408_v3 = vadd.f32 %v724_v61, %v924_v40  ;;  %v440_v45 = vadd.f32 %v732_v62, %v924_v40 }
 0x113   : > { %v575_v2 = vadd.f32 %v560_v60, %v559_v59  ;;  %v400_v4 = vadd.f32 %v924_v40, %v399_v63  ;;  %v725_v5 = vpop.f32.mrb[6].mxu0  ;;  %v733_v6 = vpop.f32.mrb[6].mxu1  ;;  %v432_v36 = vadd.f32 %v924_v40, %v431_v0 }
 0x114   : > { %v402_v8 = vpop.f32.mrb[7].mxu0  ;;  %v434_v9 = vpop.f32.mrb[7].mxu1  ;;  %v411_v12 = vadd.f32 %v725_v5, %v924_v40  ;;  %v452_v15 = vmax.f32 %v408_v3, 0.0  ;;  %v443_v50 = vadd.f32 %v733_v6, %v924_v40  ;;  %v460_v54 = vmax.f32 %v440_v45, 0.0 }
 0x115   : > { %v576_v10 = vadd.f32 %v575_v2, %v561_v1  ;;  %v450_v11 = vmax.f32 %v400_v4, 0.0  ;;  %v403_v13 = vadd.f32 %v924_v40, %v402_v8  ;;  %v435_v42 = vadd.f32 %v924_v40, %v434_v9  ;;  %v552_v60 = vpop.permute.xlu0 %551 }
 0x116   : > { %v453_v22 = vmax.f32 %v411_v12, 0.0  ;;  %v565_v27 = vmul.f32 %v512_v56, %v452_v15  ;;  %v458_v46 = vmax.f32 %v432_v36, 0.0  ;;  %v573_v61 = vmul.f32 %v552_v60, %v460_v54 }
 0x117   : > { %v563_v16 = vmul.f32 %v502_v38, %v450_v11  ;;  %v577_v17 = vadd.f32 %v576_v10, %v562_v7  ;;  %v451_v18 = vmax.f32 %v403_v13, 0.0  ;;  %v537_v38 = vpop.permute.xlu1 %536  ;;  %v459_v51 = vmax.f32 %v435_v42, 0.0  ;;  %v462_v7 = vld [vmem:[#allocation2] sm:$0x1] }
 0x118   : > { %v566_v31 = vmul.f32 %v517_v57, %v453_v22  ;;  %v570_v49 = vmul.f32 %v537_v38, %v457_v41  ;;  %v571_v55 = vmul.f32 %v542_v48, %v458_v46  ;;  %v461_v57 = vmax.f32 %v443_v50, 0.0 }
 0x119   : > { %v578_v21 = vadd.f32 %v577_v17, %v563_v16  ;;  %v564_v23 = vmul.f32 %v507_v39, %v451_v18  ;;  %v568_v39 = vmul.f32 %v527_v24, %v455_v30 }
 0x11b   : > { %v579_v28 = vadd.f32 %v578_v21, %v564_v23  ;;  %v547_v53 = vpop.permute.xlu1 %546 }
 0x11c   : > { %v572_v58 = vmul.f32 %v547_v53, %v459_v51 }
 0x11d   : > { %v580_v32 = vadd.f32 %v579_v28, %v565_v27 }
 0x11f   : > { %v581_v37 = vadd.f32 %v580_v32, %v566_v31  ;;  %v557_v62 = vpop.permute.xlu1 %556 }
 0x120   : > { %v574_v0 = vmul.f32 %v557_v62, %v461_v57 }
 0x121   : > { %v582_v43 = vadd.f32 %v581_v37, %v567_v35 }
 0x123   : > { %v583_v47 = vadd.f32 %v582_v43, %v568_v39 }
 0x125   : > { %v584_v52 = vadd.f32 %v583_v47, %v569_v44 }
 0x127   : > { %v585_v56 = vadd.f32 %v584_v52, %v570_v49 }
 0x129   : > { %v586_v59 = vadd.f32 %v585_v56, %v571_v55 }
 0x12b   : > { %v587_v63 = vadd.f32 %v586_v59, %v572_v58 }
 0x12d   : > { %v588_v1 = vadd.f32 %v587_v63, %v573_v61 }
 0x12f   : > { %v589_v2 = vadd.f32 %v588_v1, %v574_v0 }
 0x131   : > { %v590_v3 = vrot.slane %v589_v2, 4 }
 0x133   : > { %v591_v40 = vadd.f32 %v590_v3, %v589_v2 }
 0x135   : > { %v592_v4 = vrot.slane %v591_v40, 2 }
 0x137   : > { %v593_v5 = vadd.f32 %v592_v4, %v591_v40 }
 0x139   : > { %v594_v6 = vrot.slane %v593_v5, 1 }
 0x13b   : > { %v595_v8 = vadd.f32 %v594_v6, %v593_v5 }
 0x13d   : > { %v596_v9 = vadd.f32 %v595_v8, %v462_v7 }
 0x13f   : > { %597 = vst [vmem:[#allocation2] sm:$0x1] %v596_v9 }
 0x140   : > { %798 = shalt.err (!%p795_p12)
}
 0x141   : > { %s799_s26 = scalar_lea.hbm %s972_s4, 16 }
 0x142   : > { %p800_p13 = scmp.ne.s32.totalorder %s972_s4, %s799_s26  ;;  %p805_p2 = scmp.lt.u32.totalorder %s799_s26, %s972_s4 }
 0x144   : > { %p801_p0 = pnand %p800_p13, %p754_p5 }
 0x146   : > { %p802_p1 = pneg %p801_p0 }
 0x148   : > { %p807_p3 = pnand %p805_p2, %p802_p1 }
 0x14a   : > { %810 = shalt.err (!%p807_p3)
}
 0x14b   : > { %751 = dma.vmem_to_hbm [thread:$0]  (%p754_p5), %s606_s21, 16, %s972_s4, [#allocation3]  }
 0x14c   : > { %816 = dma.done.wait (%p754_p5), [#allocation3], 16  }
 0x14d   : > { %818 = vsyncadd (%p754_p5), [#allocation3], 4294967280 }
 0x14e PF: > { %s15_s15 = sadd.s32 1, %s821_s15  }
 0x14f   : > { %p12_p4 = scmp.ge.s32.totalorder %s15_s15, 4  }
 0x151   :  { %14 = sbr.rel (!%p12_p4) target bundleno = 1 (0x1), region = 70 }
 0x158   :  { %618 = vsyncpa [#allocation3], 1 }
 0x159   :  { %620 = vsyncpa [#allocation3 + $0x1], 1 }

</bundles_post_ra>
